<compile_context>
chip_gen: v7x
topology: tpu7x:2x2x1
jax: 0.10.0
libtpu: 0.0.40
codegen_flags: <defaults>
</compile_context>

<pallas_src>
import math

import jax
import jax.numpy as jnp
from jax.experimental import pallas as pl
from jax.experimental.pallas import tpu as pltpu


def _to_2tuple(v):
    if isinstance(v, (tuple, list)):
        assert len(v) == 2
        return tuple(v)
    return (v, v)


def get_pad_shape(input_shape, kernel_size, stride, dilation):
    """Identical arithmetic to AdaptivePadding.get_pad_shape."""
    input_h, input_w = input_shape
    kernel_h, kernel_w = _to_2tuple(kernel_size)
    stride_h, stride_w = _to_2tuple(stride)
    dil_h, dil_w = _to_2tuple(dilation)
    output_h = math.ceil(input_h / stride_h)
    output_w = math.ceil(input_w / stride_w)
    pad_h = max((output_h - 1) * stride_h + (kernel_h - 1) * dil_h + 1 - input_h, 0)
    pad_w = max((output_w - 1) * stride_w + (kernel_w - 1) * dil_w + 1 - input_w, 0)
    return pad_h, pad_w


def _choose_c_blk(c, in_h, in_w, out_h, out_w, itemsize,
                  vmem_budget_bytes=8 << 20):
    """Largest divisor of c whose double-buffered (in + out) blocks fit budget."""
    per_ch = (in_h * in_w + out_h * out_w) * itemsize * 2  # x2 double buffering
    max_cb = max(1, vmem_budget_bytes // max(per_ch, 1))
    cb = 1
    for d in range(1, c + 1):
        if c % d == 0 and d <= max_cb:
            cb = d
    return cb


def _make_pad_kernel(top, bottom, left, right):
    """top/bottom/left/right are Python ints -> static shapes in the kernel."""

    def pad_kernel(x_ref, o_ref):
        x = x_ref[...]                      # (1, C_blk, in_h, in_w)
        n_, cb, in_h, in_w = x.shape
        dtype = x.dtype

        # Assemble the padded tile in registers: zero strips around the input,
        # then a single full-tile store (interior written exactly once).
        parts_w = []
        if left > 0:
            parts_w.append(jnp.zeros((n_, cb, in_h, left), dtype))
        parts_w.append(x)
        if right > 0:
            parts_w.append(jnp.zeros((n_, cb, in_h, right), dtype))
        xw = jnp.concatenate(parts_w, axis=3) if len(parts_w) > 1 else x

        out_w = in_w + left + right
        parts_h = []
        if top > 0:
            parts_h.append(jnp.zeros((n_, cb, top, out_w), dtype))
        parts_h.append(xw)
        if bottom > 0:
            parts_h.append(jnp.zeros((n_, cb, bottom, out_w), dtype))
        padded = jnp.concatenate(parts_h, axis=2) if len(parts_h) > 1 else xw

        o_ref[...] = padded                 # ONE full-tile store

    return pad_kernel


def adaptive_padding(x, kernel_size=1, stride=1, dilation=1, padding="corner"):
    """JAX/Pallas equivalent of AdaptivePadding.forward. x is NCHW."""
    assert padding in ("same", "corner")
    n, c, in_h, in_w = x.shape
    pad_h, pad_w = get_pad_shape((in_h, in_w), kernel_size, stride, dilation)

    if pad_h == 0 and pad_w == 0:
        return x

    if padding == "corner":
        top, left = 0, 0
        bottom, right = pad_h, pad_w
    else:  # "same": floor before, remainder after (matches F.pad order)
        top, bottom = pad_h // 2, pad_h - pad_h // 2
        left, right = pad_w // 2, pad_w - pad_w // 2

    out_h, out_w = in_h + pad_h, in_w + pad_w

    c_blk = _choose_c_blk(c, in_h, in_w, out_h, out_w, x.dtype.itemsize)
    grid = (n, c // c_blk)

    kernel = _make_pad_kernel(top, bottom, left, right)

    return pl.pallas_call(
        kernel,
        out_shape=jax.ShapeDtypeStruct((n, c, out_h, out_w), x.dtype),
        grid=grid,
        # Last two dims of each block equal the full H/W extents, so the
        # (8,128) divisibility rule does not apply.
        in_specs=[pl.BlockSpec((1, c_blk, in_h, in_w),
                               lambda i, j: (i, j, 0, 0))],
        out_specs=pl.BlockSpec((1, c_blk, out_h, out_w),
                               lambda i, j: (i, j, 0, 0)),
        compiler_params=pltpu.CompilerParams(
            dimension_semantics=("parallel", "parallel"),
        ),
    )(x)


if __name__ == "__main__":
    key = jax.random.PRNGKey(0)
    # Shapes consistent with the module's docstring example:
    # kernel_size=16, stride=16, input 15x17 -> padded to 16x32.
    x = jax.random.normal(key, (2, 4, 15, 17), dtype=jnp.float32)

    out_corner = adaptive_padding(x, kernel_size=16, stride=16, dilation=1,
                                  padding="corner")
    out_same = adaptive_padding(x, kernel_size=16, stride=16, dilation=1,
                                padding="same")
    jax.block_until_ready(out_corner)
    jax.block_until_ready(out_same)

    # Reference check against plain jnp.pad (same semantics as F.pad zeros).
    pad_h, pad_w = get_pad_shape((15, 17), 16, 16, 1)
    ref_corner = jnp.pad(x, ((0, 0), (0, 0), (0, pad_h), (0, pad_w)))
    ref_same = jnp.pad(
        x,
        ((0, 0), (0, 0),
         (pad_h // 2, pad_h - pad_h // 2),
         (pad_w // 2, pad_w - pad_w // 2)),
    )
    assert out_corner.shape == (2, 4, 16, 32)
    assert out_same.shape == (2, 4, 16, 32)
    assert jnp.allclose(out_corner, ref_corner)
    assert jnp.allclose(out_same, ref_same)

    # No-pad path (already aligned input): returns input unchanged.
    x16 = jax.random.normal(key, (2, 4, 16, 32), dtype=jnp.float32)
    out_nopad = adaptive_padding(x16, kernel_size=16, stride=16, dilation=1)
    jax.block_until_ready(out_nopad)
    assert out_nopad.shape == x16.shape
    assert jnp.allclose(out_nopad, x16)

    print("KERNEL_OK")
</pallas_src>

<mosaic_0001>
module attributes {stable_mosaic.version = 11 : i64} {
  func.func @pad_kernel(%arg0: i32, %arg1: i32, %arg2: memref<1x4x15x17xf32, #tpu.memory_space<vmem>>, %arg3: memref<1x4x16x32xf32, #tpu.memory_space<vmem>>) attributes {dimension_semantics = [#tpu.dimension_semantics<parallel>, #tpu.dimension_semantics<parallel>], iteration_bounds = array<i64: 2, 1>, scalar_prefetch = 0 : i64, scratch_operands = 0 : i64, tpu.core_type = #tpu.core_type<tc>, window_params = [{transform_indices = @transform_0, window_bounds = array<i64: 1, 4, 15, 17>}, {transform_indices = @transform_1, window_bounds = array<i64: 1, 4, 16, 32>}]} {
    %c0 = arith.constant 0 : index
    %c0_0 = arith.constant 0 : index
    %c0_1 = arith.constant 0 : index
    %c0_2 = arith.constant 0 : index
    %0 = vector.load %arg2[%c0, %c0_0, %c0_1, %c0_2] : memref<1x4x15x17xf32, #tpu.memory_space<vmem>>, vector<1x4x15x17xf32>
    %cst = arith.constant 0.000000e+00 : f32
    %1 = vector.broadcast %cst : f32 to vector<1x4x15x15xf32>
    %2 = tpu.concatenate %0, %1 in 3 : vector<1x4x15x17xf32>, vector<1x4x15x15xf32> -> vector<1x4x15x32xf32>
    %cst_3 = arith.constant 0.000000e+00 : f32
    %3 = vector.broadcast %cst_3 : f32 to vector<1x4x1x32xf32>
    %4 = tpu.concatenate %2, %3 in 2 : vector<1x4x15x32xf32>, vector<1x4x1x32xf32> -> vector<1x4x16x32xf32>
    %c0_4 = arith.constant 0 : index
    %c0_5 = arith.constant 0 : index
    %c0_6 = arith.constant 0 : index
    %c0_7 = arith.constant 0 : index
    %5 = vector.load %arg3[%c0_4, %c0_5, %c0_6, %c0_7] : memref<1x4x16x32xf32, #tpu.memory_space<vmem>>, vector<1x4x16x32xf32>
    tpu.vector_store %arg3[%c0_4, %c0_5, %c0_6, %c0_7], %4 {strides = array<i32>} : memref<1x4x16x32xf32, #tpu.memory_space<vmem>>, vector<1x4x16x32xf32>,
    return
  }
  func.func @transform_0(%arg0: i32, %arg1: i32) -> (i32, i32, i32, i32) {
    %c0_i32 = arith.constant 0 : i32
    %c0_i32_0 = arith.constant 0 : i32
    %c0_i32_1 = arith.constant 0 : i32
    return %arg0, %arg1, %c0_i32, %c0_i32_0 : i32, i32, i32, i32
  }
  func.func @transform_1(%arg0: i32, %arg1: i32) -> (i32, i32, i32, i32) {
    %c0_i32 = arith.constant 0 : i32
    %c0_i32_0 = arith.constant 0 : i32
    %c0_i32_1 = arith.constant 0 : i32
    return %arg0, %arg1, %c0_i32, %c0_i32_0 : i32, i32, i32, i32
  }
}

</mosaic_0001>

<bundles_post_ra>
// kernel: tpu_custom_call.1
= control target key start
LH: loop header
LB: loop body
LE: loop exit
PB: predicated region body
PF: predicated region fallthrough
CT: control target
= control target key end

     0   :  { %6 = vsyncpa [#allocation3], 0  ;;  %s594_s0 = inlined_call_operand.vmem [shape: f32[2,4,15,17], index: 0, kind: input, shape index: {}]   ;;  %s595_s1 = inlined_call_operand.hbm [shape: f32[2,4,16,32], index: 1, kind: output, shape index: {}]  }
   0x1   :  { %8 = vsyncpa [#allocation3 + $0x1], 0  ;;  %s444_s6 = smov 0   ;;  %s446_s7 = smov 0  }
   0x2   :  { %s448_s8 = smov 0   ;;  %s450_s9 = smov 0  }
   0x3   :  { %s452_s10 = smov 0   ;;  %s454_s11 = smov 0  }
   0x4 LB: > { %s279_s12 = sadd.s32 4294967295, %s429_s11   ;;  %s280_s13 = sadd.s32 4294967294, %s429_s11   ;;  %s429_s11 = sphi %s454_s11, %s14_s11   ;;  %s425_s10 = sphi %s452_s10, %s602_s10   ;;  %s421_s9 = sphi %s450_s9, %s601_s9   ;;  %s417_s8 = sphi %s448_s8, %s600_s8   ;;  %s413_s7 = sphi %s446_s7, %s599_s7   ;;  %s409_s6 = sphi %s444_s6, %s598_s6  }
   0x5   : > { %s26_s14 = sadd.s32 1, %s425_s10  ;;  %s63_s15 = sadd.s32 1, %s417_s8 }
   0x6   : > { %p28_p0 = scmp.ge.s32.totalorder %s26_s14, 2  ;;  %p73_p1 = scmp.ne.s32.totalorder %s417_s8, %s413_s7 }
   0x7   : > { %p74_p2 = scmp.eq.s32.totalorder %s279_s12, 1  ;;  %p79_p3 = scmp.ne.s32.totalorder %s413_s7, %s409_s6 }
   0x8   : > { %s604_s14 = smov (%p28_p0, %s26_s14), 0  ;;  %p80_p5 = scmp.eq.s32.totalorder %s280_s13, 1 }
   0x9   : > { %p484_p4 = por %p74_p2, %p73_p1  ;;  %s58_s17 = ssub.s32 %s425_s10, %s604_s14 }
   0xa   : > { %p283_p6 = scmp.ge.s32.totalorder %s429_s11, 1  ;;  %p61_p7 = scmp.eq.s32.totalorder %s58_s17, 0 }
   0xb   : > { %p491_p8 = por %p80_p5, %p79_p3  ;;  %p112_p9 = scmp.lt.s32.totalorder %s429_s11, 3 }
   0xc   : > { %s497_s19 = scalar_select %p61_p7, %s417_s8, %s63_s15  }
   0xd   : > { %p113_p10 = pnand %p283_p6, %p112_p9 }
   0xe   : > { %s134_s20 = sand.u32 (!%p113_p10), 1, %s413_s7   ;;  %p138_p11 = scmp.lt.s32.totalorder (!%p113_p10), %s421_s9, 1  ;;  %vm157_vm0 = vcmask (!%p113_p10), 138240   ;;  %vm171_vm1 = vcmask (!%p113_p10), 261120   ;;  %vm166_vm2 = vcmask (!%p113_p10), 1046528  }
   0xf   : > { %116 = sbr.rel (%p113_p10) target bundleno = 48 (0x30), region = 24  ;;  %s284_s21 = sshll.u32 (!%p113_p10), %s134_s20, 6 }
  0x10   : > { %s507_s27 = scalar_lea.vmem (!%p113_p10), [#allocation2], %s284_s21  ;;  %s293_s29 = sshll.u32 (!%p113_p10), %s421_s9, 10 }
  0x11   : > { %s197_s28 = sshll.u32 (!%p113_p10), %s507_s27, 4  ;;  %s533_s3 = scalar_lea.hbm (!%p113_p10), %s595_s1, %s293_s29  ;;  %s521_s28 = int_to_ptr.vmem [resolvable:$true] %s197_s28 }
  0x12   : > { %s548_s4 = scalar_lea.sflag (!%p113_p10), [#allocation3], %s134_s20  ;;  %s351_s5 = scalar_lea.vmem (!%p113_p10), %s521_s28, 1024 }
  0x13   : > { %p352_p12 = scmp.ne.s32.totalorder (!%p113_p10), %s521_s28, %s351_s5 }
  0x15   : > { %p353_p13 = pnand (!%p113_p10), %p352_p12, %p484_p4 }
  0x16   : > { %s139_s22 = scalar_select %p138_p11, %s421_s9, 1 }
  0x17   : > { %p354_p0 = pneg %p353_p13  ;;  %s431_s9 = smov [#allocation2]  }
  0x18   : > { %s292_s23 = sshll.u32 %s139_s22, 6  ;;  %s355_s12 = sshll.u32 %s431_s9, 4  ;;  %s356_s12 = int_to_ptr.vmem [resolvable:$false] %s355_s12 }
  0x19   : > { %s146_s26 = scalar_lea.vmem %s594_s0, %s292_s23  ;;  %s357_s13 = scalar_lea.vmem %s356_s12, 2048 }
  0x1a   : > { %v149_v0 = vld [vmem:[%s146_s26] sm:$0xff]  ;;  %v150_v1 = vld [vmem:[%s146_s26 + $0x8] sm:$0x7f]  ;;  %v151_v2 = vld [vmem:[%s146_s26 + $0x10] sm:$0xff]  ;;  %p358_p1 = scmp.lt.s32.totalorder %s521_s28, %s356_s12  ;;  %p359_p2 = scmp.lt.s32.totalorder %s357_s13, %s351_s5 }
  0x1b   : > { %v158_v3 = vsel %vm157_vm0, %v149_v0, 0.0  ;;  %v159_v4 = vsel %vm157_vm0, %v150_v1, 0.0  ;;  %v160_v5 = vsel %vm157_vm0, %v151_v2, 0.0  ;;  %v152_v6 = vld [vmem:[%s146_s26 + $0x18] sm:$0x7f]  ;;  %v153_v7 = vld [vmem:[%s146_s26 + $0x20] sm:$0xff] }
  0x1c   : > { %172 = vst.msk [vmem:[%s507_s27] sm:$0xff] %vm171_vm1, %v158_v3  ;;  %v167_v8 = vsel %vm166_vm2, %v159_v4, 0.0  ;;  %174 = vst.msk [vmem:[%s507_s27 + $0x10] sm:$0xff] %vm171_vm1, %v160_v5  ;;  %v161_v9 = vsel %vm157_vm0, %v152_v6, 0.0  ;;  %v162_v10 = vsel %vm157_vm0, %v153_v7, 0.0  ;;  %v155_v12 = vld [vmem:[%s146_s26 + $0x30] sm:$0xff]  ;;  %p360_p3 = por %p359_p2, %p358_p1 }
  0x1d   : > { %v154_v11 = vld [vmem:[%s146_s26 + $0x28] sm:$0x7f]  ;;  %173 = vst.msk [vmem:[%s507_s27 + $0x8] sm:$0xff] %vm171_vm1, %v167_v8  ;;  %v168_v13 = vsel %vm166_vm2, %v161_v9, 0.0  ;;  %176 = vst.msk [vmem:[%s507_s27 + $0x20] sm:$0xff] %vm171_vm1, %v162_v10  ;;  %v164_v15 = vsel %vm157_vm0, %v155_v12, 0.0 }
  0x1e   : > { %v163_v14 = vsel %vm157_vm0, %v154_v11, 0.0  ;;  %v156_v16 = vld [vmem:[%s146_s26 + $0x38] sm:$0x7f]  ;;  %175 = vst.msk [vmem:[%s507_s27 + $0x18] sm:$0xff] %vm171_vm1, %v168_v13  ;;  %178 = vst.msk [vmem:[%s507_s27 + $0x30] sm:$0xff] %vm171_vm1, %v164_v15  ;;  %p361_p5 = pnand %p360_p3, %p354_p0 }
  0x1f   : > { %v169_v17 = vsel %vm166_vm2, %v163_v14, 0.0  ;;  %v165_v18 = vsel %vm157_vm0, %v156_v16, 0.0 }
  0x20   : > { %177 = vst.msk [vmem:[%s507_s27 + $0x28] sm:$0xff] %vm171_vm1, %v169_v17  ;;  %v170_v19 = vsel %vm166_vm2, %v165_v18, 0.0 }
  0x21   : > { %179 = vst.msk [vmem:[%s507_s27 + $0x38] sm:$0xff] %vm171_vm1, %v170_v19 }
  0x22   : > { %364 = shalt.err (!%p361_p5)
}
  0x23   : > { %s365_s15 = scalar_lea.hbm %s533_s3, 1024  ;;  %s369_s21 = scalar_lea.hbm %s595_s1, 2048 }
  0x24   : > { %p366_p6 = scmp.ne.s32.totalorder %s533_s3, %s365_s15  ;;  %p370_p10 = scmp.lt.u32.totalorder %s533_s3, %s595_s1 }
  0x25   : > { %p371_p11 = scmp.lt.u32.totalorder %s369_s21, %s365_s15  ;;  %p373_p13 = scmp.lt.u32.totalorder %s365_s15, %s533_s3 }
  0x26   : > { %p367_p7 = pnand %p366_p6, %p484_p4 }
  0x27   : > { %p372_p12 = por %p371_p11, %p370_p10 }
  0x28   : > { %p368_p9 = pneg %p367_p7 }
  0x29   : > { %p374_p0 = por %p373_p13, %p372_p12 }
  0x2b   : > { %p375_p1 = pnand %p374_p0, %p368_p9 }
  0x2d   : > { %378 = shalt.err (!%p375_p1)
}
  0x2e   : > { %s432_s24 = smov 128   ;;  %s433_s25 = smov 8  }
  0x2f   : > { %294 = dma.vmem_to_hbm [thread:$0]  (%p484_p4), %s521_s28, 1024, %s533_s3, %s548_s4, %s432_s24, %s432_s24, %s433_s25  }
  0x30 PF: > { %p300_p2 = scmp.ge.s32.totalorder %s429_s11, 2  ;;  %s212_s26 = sand.u32 1, %s409_s6  }
  0x31   : > { %s213_s27 = scalar_lea.sflag [#allocation3], %s212_s26 }
  0x32   : > { %p297_p3 = pnand %p300_p2, %p491_p8 }
  0x34   : > { %404 = dma.done.wait (!%p297_p3), %s213_s27, 1024  }
  0x35   : > { %406 = vsyncadd (!%p297_p3), %s213_s27, 4294966272  ;;  %s14_s11 = sadd.s32 1, %s429_s11   ;;  %s598_s6 = smov %s413_s7 }
  0x36   : > { %p11_p5 = scmp.ge.s32.totalorder %s14_s11, 4   ;;  %s599_s7 = smov %s417_s8 }
  0x37   : > { %s600_s8 = smov %s497_s19  ;;  %s601_s9 = smov %s425_s10 }
  0x38   : > { %s602_s10 = smov %s604_s14  ;;  %13 = sbr.rel (!%p11_p5) target bundleno = 4 (0x4), region = 59 }
  0x3f   :  { %218 = vsyncpa [#allocation3], 1 }
  0x40   :  { %220 = vsyncpa [#allocation3 + $0x1], 1 }

</bundles_post_ra>
